<compile_context>
chip_gen: v7x
topology: tpu7x:2x2x1
jax: 0.10.0
libtpu: 0.0.40
codegen_flags: <defaults>
</compile_context>

<pallas_src>
import functools

import jax
import jax.numpy as jnp
import numpy as np
from jax.experimental import pallas as pl
from jax.experimental.pallas import tpu as pltpu

GAMMA = 2.0
LABEL_SMOOTHING = 0.01
C_PAD = 8                 # class axis padded to one sublane group
DEFAULT_BLOCK_B = 32768   # samples (lanes) per grid step (~1 MiB f32 per input block)

# language -> per-class alpha (mirrors WeightedFocalLoss.__init__)
ALPHA_TABLE = {
    'en': [0.2, 0.8, 0.3, 0.9, 0.4, 0.85],
    'ru': [0.18, 0.82, 0.28, 0.88, 0.35, 0.83],
    'tr': [0.19, 0.81, 0.29, 0.89, 0.36, 0.84],
    'default': [0.25] * 6,
}
LANG_BOOST = {'en': 1.2, 'ru': 1.1, 'tr': 1.1, 'es': 1.0, 'fr': 1.0,
              'it': 1.0, 'pt': 1.0}


def _round_up(x, m):
    return ((x + m - 1) // m) * m


def _focal_loss_kernel(preds_ref, targets_ref, lang_ref, table_ref,
                       out_ref, acc_ref, *, inv_batch):
    """One (C_PAD, TB) lane-dense block of the focal-loss hot path."""
    i = pl.program_id(0)

    @pl.when(i == 0)
    def _init():
        acc_ref[...] = jnp.zeros_like(acc_ref)

    x = preds_ref[...].astype(jnp.float32)      # logits  (C_PAD, TB)
    t = targets_ref[...].astype(jnp.float32)    # labels  (C_PAD, TB)

    # label smoothing (matches: targets*(1-ls) + 0.5*ls)
    t = t * (1.0 - LABEL_SMOOTHING) + 0.5 * LABEL_SMOOTHING

    # language-specific alpha, gathered from the tiny table by per-sample
    # language index (replaces a dense (B, C) f32 alpha stream from HBM).
    # Padded samples select the all-zero column; padded class rows are zero.
    lang = lang_ref[...]                         # (1, TB) int32
    table = table_ref[...]                       # (C_PAD, n_cols) f32
    alpha = jnp.zeros(x.shape, jnp.float32)
    for l in range(table_ref.shape[1]):          # n_cols is small and static
        alpha = jnp.where(lang == l, table[:, l:l + 1], alpha)

    # shared transcendentals: one exp, one log, one reciprocal per element
    e = jnp.exp(-jnp.abs(x))
    # BCEWithLogitsLoss(reduction='none'), stable form: max(x,0) - x*t + log1p(exp(-|x|))
    bce = jnp.maximum(x, 0.0) - x * t + jnp.log1p(e)
    inv = 1.0 / (1.0 + e)
    probs = jnp.where(x >= 0.0, inv, e * inv)    # == sigmoid(x), reuses e & inv

    # NOTE: comparison is against the *smoothed* targets, exactly as in torch
    # (so with smoothing enabled the t==1 branch is never taken).
    pt = jnp.where(t == 1.0, probs, 1.0 - probs)
    pt = jnp.clip(pt, 1e-7, 1.0)
    w = 1.0 - pt
    focal = w * w                                 # gamma == 2 -> explicit square

    loss = alpha * focal * bce                    # (C_PAD, TB); padding has alpha=0

    part = jnp.sum(loss, axis=1, keepdims=True)   # lane reduce    -> (C_PAD, 1)
    part = jnp.sum(part, axis=0, keepdims=True)   # sublane reduce -> (1, 1)
    acc_ref[...] += part

    @pl.when(i == pl.num_programs(0) - 1)
    def _finalize():
        # sum over classes + mean over the TRUE batch == global sum / B
        out_ref[...] = acc_ref[...] * inv_batch


def _build_lang_columns(langs, b, c):
    """Host glue: per-sample language index + (C_PAD, n_cols) alpha table."""
    def col(vals):
        v = np.zeros((C_PAD,), np.float32)
        v[:c] = vals
        return v

    if langs is None:
        return np.zeros((b,), np.int32), col(np.full((c,), 0.25, np.float32))[:, None]

    if c != len(ALPHA_TABLE['default']):
        # mirrors torch: shape mismatch inside calculate_alpha_weights raises,
        # the except path returns an all-ones alpha tensor.
        return np.zeros((b,), np.int32), col(np.ones((c,), np.float32))[:, None]

    col_of, cols = {}, []
    idx = np.zeros((b,), np.int32)
    for i, lang in enumerate(langs):
        if lang not in col_of:
            a = np.asarray(ALPHA_TABLE.get(lang, ALPHA_TABLE['default']), np.float32)
            a = a * np.float32(LANG_BOOST.get(lang, 1.0))
            col_of[lang] = len(cols)
            cols.append(col(a))
        idx[i] = col_of[lang]
    return idx, np.stack(cols, axis=1)


def weighted_focal_loss(preds, targets, langs=None, *, block_b=DEFAULT_BLOCK_B):
    """JAX wrapper reproducing WeightedFocalLoss.forward semantics."""
    preds = jnp.asarray(preds)
    targets = jnp.asarray(targets)
    if preds.ndim == 1:
        preds = preds[:, None]
    if targets.ndim == 1:
        targets = targets[:, None]
    if not jnp.issubdtype(preds.dtype, jnp.floating):
        preds = preds.astype(jnp.float32)
    targets = targets.astype(preds.dtype)

    b, c = targets.shape
    assert preds.shape == (b, c)
    assert c <= C_PAD, f"expected at most {C_PAD} classes, got {c}"

    # Host-side glue: language -> column index + small alpha table.
    lang_idx, table = _build_lang_columns(langs, b, c)
    # reserve an all-zero column for padded batch lanes
    table = np.concatenate([table, np.zeros((C_PAD, 1), np.float32)], axis=1)
    pad_col = table.shape[1] - 1
    n_cols = table.shape[1]

    # Batch tiling (lane axis): pad to a multiple of the block width.
    block_b = max(128, _round_up(int(block_b), 128))
    block_eff = min(block_b, _round_up(b, 128))
    b_pad = _round_up(b, block_eff)
    grid = (b_pad // block_eff,)

    # Lane-dense layout: classes on sublanes (padded to 8), samples on lanes.
    preds_t = jnp.pad(preds.T, ((0, C_PAD - c), (0, b_pad - b)))
    targets_t = jnp.pad(targets.T, ((0, C_PAD - c), (0, b_pad - b)))

    lang_full = np.full((1, b_pad), pad_col, np.int32)
    lang_full[0, :b] = lang_idx
    lang_arr = jnp.asarray(lang_full)
    table_arr = jnp.asarray(table)

    itemsize = np.dtype(preds_t.dtype).itemsize
    elems = C_PAD * b_pad
    cost = pl.CostEstimate(
        flops=int(25 * elems),
        transcendentals=int(3 * elems),
        bytes_accessed=int(2 * elems * itemsize + 4 * b_pad + 4 * C_PAD * n_cols + 4),
    )

    kernel = functools.partial(_focal_loss_kernel, inv_batch=float(1.0 / b))

    # TODO(synk): on v7x, emit per-block partial sums (parallel grid axis) to use
    # both TensorCores; a single resident accumulator keeps this axis "arbitrary".
    out = pl.pallas_call(
        kernel,
        out_shape=jax.ShapeDtypeStruct((1, 1), jnp.float32),
        grid_spec=pltpu.PrefetchScalarGridSpec(
            num_scalar_prefetch=0,
            grid=grid,
            in_specs=[
                pl.BlockSpec((C_PAD, block_eff), lambda i: (0, i)),   # preds
                pl.BlockSpec((C_PAD, block_eff), lambda i: (0, i)),   # targets
                pl.BlockSpec((1, block_eff), lambda i: (0, i)),       # lang index
                pl.BlockSpec((C_PAD, n_cols), lambda i: (0, 0)),      # alpha table
            ],
            out_specs=pl.BlockSpec((1, 1), lambda i: (0, 0)),
            scratch_shapes=[pltpu.VMEM((1, 1), jnp.float32)],
        ),
        compiler_params=pltpu.CompilerParams(
            dimension_semantics=("arbitrary",)),
        cost_estimate=cost,
    )(preds_t, targets_t, lang_arr, table_arr)
    return out[0, 0]


# ---------------------------------------------------------------------------
# Pure-JAX reference (mirrors the torch module) for correctness checking.
# ---------------------------------------------------------------------------
def _alpha_weights_ref(langs, b, c):
    if langs is None:
        return np.full((b, c), 0.25, np.float32)
    aw = np.ones((b, c), np.float32)
    try:
        for i, lang in enumerate(langs):
            la = np.asarray(ALPHA_TABLE.get(lang, ALPHA_TABLE['default']), np.float32)
            la = la * np.float32(LANG_BOOST.get(lang, 1.0))
            if la.shape[0] != c:
                raise ValueError("shape mismatch")
            aw[i] = la
    except ValueError:
        return np.ones((b, c), np.float32)
    return aw


def _reference(preds, targets, alpha_weights):
    preds = preds.astype(jnp.float32)
    targets = targets.astype(jnp.float32)
    t = targets * (1.0 - LABEL_SMOOTHING) + 0.5 * LABEL_SMOOTHING
    bce = jnp.maximum(preds, 0.0) - preds * t + jnp.log1p(jnp.exp(-jnp.abs(preds)))
    probs = jax.nn.sigmoid(preds)
    pt = jnp.clip(jnp.where(t == 1.0, probs, 1.0 - probs), 1e-7, 1.0)
    focal = (1.0 - pt) ** GAMMA
    loss = alpha_weights * focal * bce
    return loss.sum(axis=-1).mean()


if __name__ == "__main__":
    key = jax.random.PRNGKey(0)
    k1, k2, k3, k4 = jax.random.split(key, 4)

    # --- test 1: 8 samples x 6 toxicity classes, mixed languages, f32
    B, C = 8, 6
    preds = jax.random.normal(k1, (B, C), jnp.float32) * 2.0
    targets = (jax.random.uniform(k2, (B, C)) > 0.5).astype(jnp.float32)
    langs = ['en', 'ru', 'tr', 'es', 'fr', 'it', 'pt', 'xx']   # 'xx' -> default
    out = weighted_focal_loss(preds, targets, langs)
    jax.block_until_ready(out)
    ref = _reference(preds, targets, jnp.asarray(_alpha_weights_ref(langs, B, C)))
    np.testing.assert_allclose(np.asarray(out), np.asarray(ref), rtol=1e-5, atol=1e-5)

    # --- test 2: multi-block grid (B=300, block_b=128 -> 3 grid steps) + lane padding
    B2 = 300
    preds2 = jax.random.normal(k3, (B2, C), jnp.float32)
    targets2 = (jax.random.uniform(k4, (B2, C)) > 0.5).astype(jnp.float32)
    langs2 = [['en', 'ru', 'tr', 'es', 'xx'][i % 5] for i in range(B2)]
    out2 = weighted_focal_loss(preds2, targets2, langs2, block_b=128)
    jax.block_until_ready(out2)
    ref2 = _reference(preds2, targets2, jnp.asarray(_alpha_weights_ref(langs2, B2, C)))
    np.testing.assert_allclose(np.asarray(out2), np.asarray(ref2), rtol=1e-5, atol=1e-5)

    # --- test 3: langs=None path (alpha = 0.25 everywhere)
    out3 = weighted_focal_loss(preds, targets, None)
    jax.block_until_ready(out3)
    ref3 = _reference(preds, targets, jnp.full((B, C), 0.25, jnp.float32))
    np.testing.assert_allclose(np.asarray(out3), np.asarray(ref3), rtol=1e-5, atol=1e-5)

    # --- test 4: bf16 inputs (half the HBM bytes), f32 math inside the kernel
    preds_bf = preds2.astype(jnp.bfloat16)
    targets_bf = targets2.astype(jnp.bfloat16)
    out4 = weighted_focal_loss(preds_bf, targets_bf, langs2)
    jax.block_until_ready(out4)
    ref4 = _reference(preds_bf, targets_bf, jnp.asarray(_alpha_weights_ref(langs2, B2, C)))
    np.testing.assert_allclose(np.asarray(out4), np.asarray(ref4), rtol=1e-4, atol=1e-4)

    # --- test 5: 1-D preds/targets path (unsqueeze to (B, 1))
    p1 = jax.random.normal(k1, (B,), jnp.float32)
    t1 = (jax.random.uniform(k2, (B,)) > 0.5).astype(jnp.float32)
    out5 = weighted_focal_loss(p1, t1, None)
    jax.block_until_ready(out5)
    ref5 = _reference(p1[:, None], t1[:, None], jnp.full((B, 1), 0.25, jnp.float32))
    np.testing.assert_allclose(np.asarray(out5), np.asarray(ref5), rtol=1e-5, atol=1e-5)

    print("KERNEL_OK")
</pallas_src>

<mosaic_0001>
module attributes {stable_mosaic.version = 11 : i64} {
  func.func @_focal_loss_kernel(%arg0: i32, %arg1: memref<8x128xf32, #tpu.memory_space<vmem>>, %arg2: memref<8x128xf32, #tpu.memory_space<vmem>>, %arg3: memref<1x128xi32, #tpu.memory_space<vmem>>, %arg4: memref<8x9xf32, #tpu.memory_space<vmem>>, %arg5: memref<1x1xf32, #tpu.memory_space<vmem>>, %arg6: memref<1x1xf32, #tpu.memory_space<vmem>>) attributes {dimension_semantics = [#tpu.dimension_semantics<arbitrary>], iteration_bounds = array<i64: 1>, scalar_prefetch = 0 : i64, scratch_operands = 1 : i64, tpu.core_type = #tpu.core_type<tc>, window_params = [{transform_indices = @transform_0, window_bounds = array<i64: 8, 128>}, {transform_indices = @transform_1, window_bounds = array<i64: 8, 128>}, {transform_indices = @transform_2, window_bounds = array<i64: 1, 128>}, {pipeline_mode = #tpu.pipeline_mode<synchronous>, transform_indices = @transform_3, window_bounds = array<i64: 8, 9>}, {pipeline_mode = #tpu.pipeline_mode<synchronous>, transform_indices = @transform_4, window_bounds = array<i64: 1, 1>}]} {
    %c0_i32 = arith.constant 0 : i32
    %0 = arith.cmpi eq, %arg0, %c0_i32 : i32
    %1 = arith.extui %0 : i1 to i32
    %c0_i32_0 = arith.constant 0 : i32
    %2 = arith.cmpi ne, %1, %c0_i32_0 : i32
    scf.if %2 {
      %cst_29 = arith.constant 0.000000e+00 : f32
      %126 = vector.broadcast %cst_29 : f32 to vector<1x1xf32>
      %c0_30 = arith.constant 0 : index
      %c0_31 = arith.constant 0 : index
      %127 = vector.load %arg6[%c0_30, %c0_31] : memref<1x1xf32, #tpu.memory_space<vmem>>, vector<1x1xf32>
      tpu.vector_store %arg6[%c0_30, %c0_31], %126 {strides = array<i32>} : memref<1x1xf32, #tpu.memory_space<vmem>>, vector<1x1xf32>,
    } else {
    }
    %c0 = arith.constant 0 : index
    %c0_1 = arith.constant 0 : index
    %3 = vector.load %arg1[%c0, %c0_1] : memref<8x128xf32, #tpu.memory_space<vmem>>, vector<8x128xf32>
    %c0_2 = arith.constant 0 : index
    %c0_3 = arith.constant 0 : index
    %4 = vector.load %arg2[%c0_2, %c0_3] : memref<8x128xf32, #tpu.memory_space<vmem>>, vector<8x128xf32>
    %cst = arith.constant 9.900000e-01 : f32
    %5 = vector.broadcast %cst : f32 to vector<8x128xf32>
    %6 = arith.mulf %4, %5 : vector<8x128xf32>
    %cst_4 = arith.constant 5.000000e-03 : f32
    %7 = vector.broadcast %cst_4 : f32 to vector<8x128xf32>
    %8 = arith.addf %6, %7 : vector<8x128xf32>
    %c0_5 = arith.constant 0 : index
    %c0_6 = arith.constant 0 : index
    %9 = vector.load %arg3[%c0_5, %c0_6] : memref<1x128xi32, #tpu.memory_space<vmem>>, vector<1x128xi32>
    %c0_7 = arith.constant 0 : index
    %c0_8 = arith.constant 0 : index
    %10 = vector.load %arg4[%c0_7, %c0_8] : memref<8x9xf32, #tpu.memory_space<vmem>>, vector<8x9xf32>
    %cst_9 = arith.constant 0.000000e+00 : f32
    %11 = vector.broadcast %cst_9 : f32 to vector<8x128xf32>
    %c0_i32_10 = arith.constant 0 : i32
    %12 = vector.broadcast %c0_i32_10 : i32 to vector<1x128xi32>
    %13 = arith.cmpi eq, %9, %12 : vector<1x128xi32>
    %14 = vector.extract_strided_slice %10 {offsets = [0, 0], sizes = [8, 1], strides = [1, 1]} : vector<8x9xf32> to vector<8x1xf32>
    %15 = vector.shape_cast %13 : vector<1x128xi1> to vector<1x128xi1>
    %16 = vector.broadcast %15 : vector<1x128xi1> to vector<8x128xi1>
    %17 = vector.shape_cast %14 : vector<8x1xf32> to vector<8x1xf32>
    %18 = vector.broadcast %17 : vector<8x1xf32> to vector<8x128xf32>
    %19 = arith.select %16, %18, %11 : vector<8x128xi1>, vector<8x128xf32>
    %c1_i32 = arith.constant 1 : i32
    %20 = vector.broadcast %c1_i32 : i32 to vector<1x128xi32>
    %21 = arith.cmpi eq, %9, %20 : vector<1x128xi32>
    %22 = vector.extract_strided_slice %10 {offsets = [0, 1], sizes = [8, 1], strides = [1, 1]} : vector<8x9xf32> to vector<8x1xf32>
    %23 = vector.shape_cast %21 : vector<1x128xi1> to vector<1x128xi1>
    %24 = vector.broadcast %23 : vector<1x128xi1> to vector<8x128xi1>
    %25 = vector.shape_cast %22 : vector<8x1xf32> to vector<8x1xf32>
    %26 = vector.broadcast %25 : vector<8x1xf32> to vector<8x128xf32>
    %27 = arith.select %24, %26, %19 : vector<8x128xi1>, vector<8x128xf32>
    %c2_i32 = arith.constant 2 : i32
    %28 = vector.broadcast %c2_i32 : i32 to vector<1x128xi32>
    %29 = arith.cmpi eq, %9, %28 : vector<1x128xi32>
    %30 = vector.extract_strided_slice %10 {offsets = [0, 2], sizes = [8, 1], strides = [1, 1]} : vector<8x9xf32> to vector<8x1xf32>
    %31 = vector.shape_cast %29 : vector<1x128xi1> to vector<1x128xi1>
    %32 = vector.broadcast %31 : vector<1x128xi1> to vector<8x128xi1>
    %33 = vector.shape_cast %30 : vector<8x1xf32> to vector<8x1xf32>
    %34 = vector.broadcast %33 : vector<8x1xf32> to vector<8x128xf32>
    %35 = arith.select %32, %34, %27 : vector<8x128xi1>, vector<8x128xf32>
    %c3_i32 = arith.constant 3 : i32
    %36 = vector.broadcast %c3_i32 : i32 to vector<1x128xi32>
    %37 = arith.cmpi eq, %9, %36 : vector<1x128xi32>
    %38 = vector.extract_strided_slice %10 {offsets = [0, 3], sizes = [8, 1], strides = [1, 1]} : vector<8x9xf32> to vector<8x1xf32>
    %39 = vector.shape_cast %37 : vector<1x128xi1> to vector<1x128xi1>
    %40 = vector.broadcast %39 : vector<1x128xi1> to vector<8x128xi1>
    %41 = vector.shape_cast %38 : vector<8x1xf32> to vector<8x1xf32>
    %42 = vector.broadcast %41 : vector<8x1xf32> to vector<8x128xf32>
    %43 = arith.select %40, %42, %35 : vector<8x128xi1>, vector<8x128xf32>
    %c4_i32 = arith.constant 4 : i32
    %44 = vector.broadcast %c4_i32 : i32 to vector<1x128xi32>
    %45 = arith.cmpi eq, %9, %44 : vector<1x128xi32>
    %46 = vector.extract_strided_slice %10 {offsets = [0, 4], sizes = [8, 1], strides = [1, 1]} : vector<8x9xf32> to vector<8x1xf32>
    %47 = vector.shape_cast %45 : vector<1x128xi1> to vector<1x128xi1>
    %48 = vector.broadcast %47 : vector<1x128xi1> to vector<8x128xi1>
    %49 = vector.shape_cast %46 : vector<8x1xf32> to vector<8x1xf32>
    %50 = vector.broadcast %49 : vector<8x1xf32> to vector<8x128xf32>
    %51 = arith.select %48, %50, %43 : vector<8x128xi1>, vector<8x128xf32>
    %c5_i32 = arith.constant 5 : i32
    %52 = vector.broadcast %c5_i32 : i32 to vector<1x128xi32>
    %53 = arith.cmpi eq, %9, %52 : vector<1x128xi32>
    %54 = vector.extract_strided_slice %10 {offsets = [0, 5], sizes = [8, 1], strides = [1, 1]} : vector<8x9xf32> to vector<8x1xf32>
    %55 = vector.shape_cast %53 : vector<1x128xi1> to vector<1x128xi1>
    %56 = vector.broadcast %55 : vector<1x128xi1> to vector<8x128xi1>
    %57 = vector.shape_cast %54 : vector<8x1xf32> to vector<8x1xf32>
    %58 = vector.broadcast %57 : vector<8x1xf32> to vector<8x128xf32>
    %59 = arith.select %56, %58, %51 : vector<8x128xi1>, vector<8x128xf32>
    %c6_i32 = arith.constant 6 : i32
    %60 = vector.broadcast %c6_i32 : i32 to vector<1x128xi32>
    %61 = arith.cmpi eq, %9, %60 : vector<1x128xi32>
    %62 = vector.extract_strided_slice %10 {offsets = [0, 6], sizes = [8, 1], strides = [1, 1]} : vector<8x9xf32> to vector<8x1xf32>
    %63 = vector.shape_cast %61 : vector<1x128xi1> to vector<1x128xi1>
    %64 = vector.broadcast %63 : vector<1x128xi1> to vector<8x128xi1>
    %65 = vector.shape_cast %62 : vector<8x1xf32> to vector<8x1xf32>
    %66 = vector.broadcast %65 : vector<8x1xf32> to vector<8x128xf32>
    %67 = arith.select %64, %66, %59 : vector<8x128xi1>, vector<8x128xf32>
    %c7_i32 = arith.constant 7 : i32
    %68 = vector.broadcast %c7_i32 : i32 to vector<1x128xi32>
    %69 = arith.cmpi eq, %9, %68 : vector<1x128xi32>
    %70 = vector.extract_strided_slice %10 {offsets = [0, 7], sizes = [8, 1], strides = [1, 1]} : vector<8x9xf32> to vector<8x1xf32>
    %71 = vector.shape_cast %69 : vector<1x128xi1> to vector<1x128xi1>
    %72 = vector.broadcast %71 : vector<1x128xi1> to vector<8x128xi1>
    %73 = vector.shape_cast %70 : vector<8x1xf32> to vector<8x1xf32>
    %74 = vector.broadcast %73 : vector<8x1xf32> to vector<8x128xf32>
    %75 = arith.select %72, %74, %67 : vector<8x128xi1>, vector<8x128xf32>
    %c8_i32 = arith.constant 8 : i32
    %76 = vector.broadcast %c8_i32 : i32 to vector<1x128xi32>
    %77 = arith.cmpi eq, %9, %76 : vector<1x128xi32>
    %78 = vector.extract_strided_slice %10 {offsets = [0, 8], sizes = [8, 1], strides = [1, 1]} : vector<8x9xf32> to vector<8x1xf32>
    %79 = vector.shape_cast %77 : vector<1x128xi1> to vector<1x128xi1>
    %80 = vector.broadcast %79 : vector<1x128xi1> to vector<8x128xi1>
    %81 = vector.shape_cast %78 : vector<8x1xf32> to vector<8x1xf32>
    %82 = vector.broadcast %81 : vector<8x1xf32> to vector<8x128xf32>
    %83 = arith.select %80, %82, %75 : vector<8x128xi1>, vector<8x128xf32>
    %84 = math.absf %3 : vector<8x128xf32>
    %cst_11 = arith.constant 0.000000e+00 : f32
    %85 = vector.broadcast %cst_11 : f32 to vector<8x128xf32>
    %86 = arith.subf %85, %84 : vector<8x128xf32>
    %87 = math.exp %86 : vector<8x128xf32>
    %cst_12 = arith.constant 0.000000e+00 : f32
    %88 = vector.broadcast %cst_12 : f32 to vector<8x128xf32>
    %89 = arith.maximumf %3, %88 : vector<8x128xf32>
    %90 = arith.mulf %3, %8 : vector<8x128xf32>
    %91 = arith.subf %89, %90 : vector<8x128xf32>
    %92 = math.log1p %87 : vector<8x128xf32>
    %93 = arith.addf %91, %92 : vector<8x128xf32>
    %cst_13 = arith.constant 1.000000e+00 : f32
    %94 = vector.broadcast %cst_13 : f32 to vector<8x128xf32>
    %95 = arith.addf %94, %87 : vector<8x128xf32>
    %cst_14 = arith.constant 1.000000e+00 : f32
    %96 = vector.broadcast %cst_14 : f32 to vector<8x128xf32>
    %97 = arith.divf %96, %95 : vector<8x128xf32>
    %cst_15 = arith.constant 0.000000e+00 : f32
    %98 = vector.broadcast %cst_15 : f32 to vector<8x128xf32>
    %99 = arith.cmpf oge, %3, %98 : vector<8x128xf32>
    %100 = arith.mulf %87, %97 : vector<8x128xf32>
    %101 = arith.select %99, %97, %100 : vector<8x128xi1>, vector<8x128xf32>
    %cst_16 = arith.constant 1.000000e+00 : f32
    %102 = vector.broadcast %cst_16 : f32 to vector<8x128xf32>
    %103 = arith.cmpf oeq, %8, %102 : vector<8x128xf32>
    %cst_17 = arith.constant 1.000000e+00 : f32
    %104 = vector.broadcast %cst_17 : f32 to vector<8x128xf32>
    %105 = arith.subf %104, %101 : vector<8x128xf32>
    %106 = arith.select %103, %101, %105 : vector<8x128xi1>, vector<8x128xf32>
    %cst_18 = arith.constant 1.000000e-07 : f32
    %cst_19 = arith.constant 1.000000e+00 : f32
    %107 = vector.broadcast %cst_18 : f32 to vector<8x128xf32>
    %108 = arith.maximumf %107, %106 : vector<8x128xf32>
    %109 = vector.broadcast %cst_19 : f32 to vector<8x128xf32>
    %110 = arith.minimumf %109, %108 : vector<8x128xf32>
    %cst_20 = arith.constant 1.000000e+00 : f32
    %111 = vector.broadcast %cst_20 : f32 to vector<8x128xf32>
    %112 = arith.subf %111, %110 : vector<8x128xf32>
    %113 = arith.mulf %112, %112 : vector<8x128xf32>
    %114 = arith.mulf %83, %113 : vector<8x128xf32>
    %115 = arith.mulf %114, %93 : vector<8x128xf32>
    %cst_21 = arith.constant dense<0.000000e+00> : vector<8xf32>
    %116 = vector.multi_reduction <add>, %115, %cst_21 [1] : vector<8x128xf32> to vector<8xf32>
    %117 = vector.shape_cast %116 : vector<8xf32> to vector<8x1xf32>
    %cst_22 = arith.constant dense<0.000000e+00> : vector<1xf32>
    %118 = vector.multi_reduction <add>, %117, %cst_22 [0] : vector<8x1xf32> to vector<1xf32>
    %119 = vector.shape_cast %118 : vector<1xf32> to vector<1x1xf32>
    %c0_23 = arith.constant 0 : index
    %c0_24 = arith.constant 0 : index
    %120 = vector.load %arg6[%c0_23, %c0_24] : memref<1x1xf32, #tpu.memory_space<vmem>>, vector<1x1xf32>
    %121 = arith.addf %120, %119 : vector<1x1xf32>
    %c0_25 = arith.constant 0 : index
    %c0_26 = arith.constant 0 : index
    %122 = vector.load %arg6[%c0_25, %c0_26] : memref<1x1xf32, #tpu.memory_space<vmem>>, vector<1x1xf32>
    tpu.vector_store %arg6[%c0_25, %c0_26], %121 {strides = array<i32>} : memref<1x1xf32, #tpu.memory_space<vmem>>, vector<1x1xf32>,
    %c0_i32_27 = arith.constant 0 : i32
    %123 = arith.cmpi eq, %arg0, %c0_i32_27 : i32
    %124 = arith.extui %123 : i1 to i32
    %c0_i32_28 = arith.constant 0 : i32
    %125 = arith.cmpi ne, %124, %c0_i32_28 : i32
    scf.if %125 {
      %c0_29 = arith.constant 0 : index
      %c0_30 = arith.constant 0 : index
      %126 = vector.load %arg6[%c0_29, %c0_30] : memref<1x1xf32, #tpu.memory_space<vmem>>, vector<1x1xf32>
      %cst_31 = arith.constant 1.250000e-01 : f32
      %127 = vector.broadcast %cst_31 : f32 to vector<1x1xf32>
      %128 = arith.mulf %126, %127 : vector<1x1xf32>
      %c0_32 = arith.constant 0 : index
      %c0_33 = arith.constant 0 : index
      %129 = vector.load %arg5[%c0_32, %c0_33] : memref<1x1xf32, #tpu.memory_space<vmem>>, vector<1x1xf32>
      tpu.vector_store %arg5[%c0_32, %c0_33], %128 {strides = array<i32>} : memref<1x1xf32, #tpu.memory_space<vmem>>, vector<1x1xf32>,
    } else {
    }
    return
  }
  func.func @transform_0(%arg0: i32) -> (i32, i32) {
    %c0_i32 = arith.constant 0 : i32
    %c0_i32_0 = arith.constant 0 : i32
    return %c0_i32, %arg0 : i32, i32
  }
  func.func @transform_1(%arg0: i32) -> (i32, i32) {
    %c0_i32 = arith.constant 0 : i32
    %c0_i32_0 = arith.constant 0 : i32
    return %c0_i32, %arg0 : i32, i32
  }
  func.func @transform_2(%arg0: i32) -> (i32, i32) {
    %c0_i32 = arith.constant 0 : i32
    %c0_i32_0 = arith.constant 0 : i32
    return %c0_i32, %arg0 : i32, i32
  }
  func.func @transform_3(%arg0: i32) -> (i32, i32) {
    %c0_i32 = arith.constant 0 : i32
    %c0_i32_0 = arith.constant 0 : i32
    %c0_i32_1 = arith.constant 0 : i32
    return %c0_i32, %c0_i32_0 : i32, i32
  }
  func.func @transform_4(%arg0: i32) -> (i32, i32) {
    %c0_i32 = arith.constant 0 : i32
    %c0_i32_0 = arith.constant 0 : i32
    %c0_i32_1 = arith.constant 0 : i32
    return %c0_i32, %c0_i32_0 : i32, i32
  }
}

</mosaic_0001>

<bundles_post_ra>
// kernel: tpu_custom_call.1
= control target key start
LH: loop header
LB: loop body
LE: loop exit
PB: predicated region body
PF: predicated region fallthrough
CT: control target
= control target key end

     0   :  { %9 = vsyncpa [#allocation4], 0  ;;  %s464_s0 = inlined_call_operand.hbm [shape: f32[8,128], index: 0, kind: input, shape index: {}]   ;;  %s465_s1 = inlined_call_operand.hbm [shape: f32[8,128], index: 1, kind: input, shape index: {}]   ;;  %s466_s2 = inlined_call_operand.vmem [shape: s32[1,128], index: 2, kind: input, shape index: {}]   ;;  %s467_s3 = inlined_call_operand.vmem [shape: f32[8,9], index: 3, kind: input, shape index: {}]   ;;  %s468_s4 = inlined_call_operand.hbm [shape: f32[1,1], index: 4, kind: output, shape index: {}]  }
   0x1   :  { %10 = vsyncpa [#allocation7], 0 }
   0x2   :  { %11 = vsyncpa [#allocation5], 0  ;;  %s329_s15 = smov [#allocation3]   ;;  %s330_s17 = smov [#allocation6]  }
   0x3   :  { %s18_s16 = sshll.u32 %s329_s15, 4  ;;  %s28_s18 = sshll.u32 %s330_s17, 4  ;;  %s19_s16 = int_to_ptr.vmem [resolvable:$true] %s18_s16  ;;  %s29_s18 = int_to_ptr.vmem [resolvable:$true] %s28_s18 }
   0x4   :  { %s257_s21 = scalar_lea.hbm %s464_s0, 128 }
   0x5   :  { %p258_p0 = scmp.ne.s32.totalorder %s464_s0, %s257_s21  ;;  %p261_p1 = scmp.lt.u32.totalorder %s257_s21, %s464_s0 }
   0x7   :  { %p263_p2 = pnand %p261_p1, %p258_p0 }
   0x9   :  { %266 = shalt.err (!%p263_p2)
}
   0xa   :  { %s267_s26 = scalar_lea.vmem %s19_s16, 128  ;;  %p272_p4 = scmp.lt.s32.totalorder %s19_s16, %s19_s16 }
   0xb   :  { %p268_p3 = scmp.ne.s32.totalorder %s19_s16, %s267_s26  ;;  %p273_p5 = scmp.lt.s32.totalorder %s267_s26, %s267_s26 }
   0xd   :  { %p274_p6 = por %p273_p5, %p272_p4 }
   0xf   :  { %p275_p7 = pnand %p274_p6, %p268_p3 }
  0x11   :  { %278 = shalt.err (!%p275_p7)
}
  0x12   :  { %21 = dma.hbm_to_vmem [thread:$0]  %s464_s0, 128, %s19_s16, [#allocation4]  }
  0x13   :  { %s279_s5 = scalar_lea.hbm %s465_s1, 128 }
  0x14   :  { %p280_p8 = scmp.ne.s32.totalorder %s465_s1, %s279_s5  ;;  %p283_p9 = scmp.lt.u32.totalorder %s279_s5, %s465_s1 }
  0x16   :  { %p285_p10 = pnand %p283_p9, %p280_p8 }
  0x18   :  { %288 = shalt.err (!%p285_p10)
}
  0x19   :  { %s289_s10 = scalar_lea.vmem %s29_s18, 128  ;;  %p294_p12 = scmp.lt.s32.totalorder %s29_s18, %s29_s18 }
  0x1a   :  { %p290_p11 = scmp.ne.s32.totalorder %s29_s18, %s289_s10  ;;  %p295_p13 = scmp.lt.s32.totalorder %s289_s10, %s289_s10 }
  0x1c   :  { %p296_p0 = por %p295_p13, %p294_p12 }
  0x1e   :  { %p297_p1 = pnand %p296_p0, %p290_p11 }
  0x20   :  { %300 = shalt.err (!%p297_p1)
}
  0x21   :  { %31 = dma.hbm_to_vmem [thread:$0]  %s465_s1, 128, %s29_s18, [#allocation7]  }
  0x22   :  { %323 = dma.done.wait [#allocation4], 128  }
  0x23   :  { %324 = vsyncadd [#allocation4], 4294967168 }
  0x24   :  { %325 = dma.done.wait [#allocation7], 128  }
  0x25   :  { %326 = vsyncadd [#allocation7], 4294967168  ;;  %v331_v0 = vmov 2   ;;  %v332_v1 = vmov 0   ;;  %v53_v2 = vld [vmem:[%s467_s3] sm:$0xff]  ;;  %v333_v3 = vmov 3   ;;  %v56_v16 = vlaneseq }
  0x26   :  { %244 = vset.pattern.permute.xlu1 %v331_v0  ;;  %242 = vset.pattern.permute.xlu0 %v332_v1  ;;  %v334_v4 = vmov 1   ;;  %v335_v5 = vmov 4   ;;  %v336_v6 = vmov 5   ;;  %v337_v7 = vmov 6   ;;  %v395_v10 = vld [vmem:[#allocation3] sm:$0xff]  ;;  %v49_v19 = vld [vmem:[#allocation6] sm:$0xff] }
  0x27   :  { %87 = vperm.xlu1 %244, %v53_v2   ;;  %63 = vperm.xlu0 %242, %v53_v2   ;;  %v338_v8 = vmov 8   ;;  %v339_v9 = vmov 7   ;;  %v163_v11 = vand.u32 2147483647, %v395_v10  ;;  %v52_v18 = vld [vmem:[%s466_s2] sm:$0x1] }
  0x28   :  { %v57_v20 = vshrl.u32 %v56_v16, 7  ;;  %vm54_vm0 = vcmp.eq.s32.totalorder %v52_v18, 0  ;;  %v50_v21 = vmul.f32 0.99, %v49_v19  ;;  %vm183_vm1 = vcmp.ge.f32.partialorder %v395_v10, 0.0  ;;  %s341_s2 = smov [#allocation8]  }
  0x29   :  { %v164_v12 = vsub.f32 0.0, %v163_v11  ;;  %vm67_vm2 = vcmp.eq.s32.totalorder %v52_v18, 1  ;;  %v55_v24 = vsel %vm54_vm0, 1, %v332_v1  ;;  %vm79_vm3 = vcmp.eq.s32.totalorder %v52_v18, 2  ;;  %s219_s14 = sshll.u32 %s341_s2, 4  ;;  %s220_s14 = int_to_ptr.vmem [resolvable:$true] %s219_s14 }
  0x2a   :  { %v406_v23 = vsub.s32 0, %v57_v20  ;;  %v51_v25 = vadd.f32 0.005, %v50_v21  ;;  %v68_v27 = vsel %vm67_vm2, 1, %v332_v1  ;;  %v80_v33 = vsel %vm79_vm3, 1, %v332_v1  ;;  %s301_s15 = scalar_lea.vmem %s220_s14, 16  ;;  %p306_p3 = scmp.lt.s32.totalorder %s220_s14, %s220_s14 }
  0x2b   :  { %245 = vset.pattern.permute.xlu1 %v333_v3  ;;  %243 = vset.pattern.permute.xlu0 %v334_v4  ;;  %v165_v13 = vmul.f32 1.442695, %v164_v12  ;;  %vm91_vm5 = vcmp.eq.s32.totalorder %v52_v18, 3  ;;  %vm103_vm7 = vcmp.eq.s32.totalorder %v52_v18, 4  ;;  %vm115_vm9 = vcmp.eq.s32.totalorder %v52_v18, 5  ;;  %p302_p2 = scmp.ne.s32.totalorder %s220_s14, %s301_s15  ;;  %s305_s16 = scalar_lea.vmem %s220_s14, 32 }
  0x2c   :  { %99 = vperm.xlu1 %245, %v53_v2   ;;  %75 = vperm.xlu0 %243, %v53_v2   ;;  %v59_v28 = vrot.slane %v55_v24, %v406_v23  ;;  %v72_v32 = vrot.slane %v68_v27, %v406_v23  ;;  %vm186_vm4 = vcmp.eq.f32.partialorder %v51_v25, 1.0  ;;  %v84_v35 = vrot.slane %v80_v33, %v406_v23  ;;  %p307_p4 = scmp.lt.s32.totalorder %s305_s16, %s301_s15 }
  0x2d   :  { %251 = vpow2.f32 %v165_v13  ;;  %v92_v38 = vsel %vm91_vm5, 1, %v332_v1  ;;  %v104_v41 = vsel %vm103_vm7, 1, %v332_v1  ;;  %vm127_vm10 = vcmp.eq.s32.totalorder %v52_v18, 6 }
  0x2e   :  { %vm413_vm6 = vcmp.eq.s32.totalorder %v59_v28, 1  ;;  %vm73_vm8 = vcmp.eq.s32.totalorder %v72_v32, 1  ;;  %vm423_vm11 = vcmp.eq.s32.totalorder %v84_v35, 1  ;;  %v96_v45 = vrot.slane %v92_v38, %v406_v23  ;;  %p308_p5 = por %p307_p4, %p306_p3 }
  0x2f   :  { %vm139_vm12 = vcmp.eq.s32.totalorder %v52_v18, 7  ;;  %v108_v47 = vrot.slane %v104_v41, %v406_v23  ;;  %v116_v48 = vsel %vm115_vm9, 1, %v332_v1  ;;  %vm151_vm13 = vcmp.eq.s32.totalorder %v52_v18, 8 }
  0x30   :  { %246 = vset.pattern.permute.xlu1 %v335_v5  ;;  %247 = vset.pattern.permute.xlu0 %v336_v6  ;;  %v128_v50 = vsel %vm127_vm10, 1, %v332_v1  ;;  %v140_v53 = vsel %vm139_vm12, 1, %v332_v1  ;;  %vm97_vm14 = vcmp.eq.s32.totalorder %v96_v45, 1  ;;  %v120_v57 = vrot.slane %v116_v48, %v406_v23  ;;  %p309_p6 = pnand %p308_p5, %p302_p2 }
  0x31   :  { %111 = vperm.xlu1 %246, %v53_v2   ;;  %123 = vperm.xlu0 %247, %v53_v2   ;;  %v152_v58 = vsel %vm151_vm13, 1, %v332_v1  ;;  %vm437_vm15 = vcmp.eq.s32.totalorder %v108_v47, 1  ;;  %v132_v60 = vrot.slane %v128_v50, %v406_v23  ;;  %v167_v61 = vmax.f32 %v395_v10, 0.0 }
  0x32   :  { %v168_v62 = vmul.f32 %v51_v25, %v395_v10  ;;  %v144_v63 = vrot.slane %v140_v53, %v406_v23  ;;  %v156_v1 = vrot.slane %v152_v58, %v406_v23  ;;  %vm46_vm5 = vcmask 0  }
  0x33   :  { %vm133_vm2 = vcmp.eq.s32.totalorder %v132_v60, 1  ;;  %v340_v20 = vmov 0.0  }
  0x34   :  { %vm145_vm3 = vcmp.eq.s32.totalorder %v144_v63, 1  ;;  %47 = vst.msk [vmem:[#allocation2] sm:$0x1] %vm46_vm5, %v340_v20 }
  0x35   :  { %248 = vset.pattern.permute.xlu1 %v337_v7  ;;  %250 = vset.pattern.permute.xlu0 %v338_v8  ;;  %v169_v8 = vsub.f32 %v167_v61, %v168_v62 }
  0x36   :  { %135 = vperm.xlu1 %248, %v53_v2   ;;  %159 = vperm.xlu0 %250, %v53_v2  }
  0x37   :  { %v398_v14 = vpop.eup %251 }
  0x38   :  { %v170_v15 = vadd.f32 1.0, %v398_v14  ;;  %v173_v42 = vmul.f32 -0.5, %v398_v14  ;;  %v176_v55 = vand.u32 2147483647, %v398_v14 }
  0x3a   :  { %249 = vset.pattern.permute.xlu1 %v339_v9  ;;  %253 = vrcp.f32 %v170_v15  ;;  %v174_v51 = vadd.f32 1.0, %v173_v42  ;;  %vm177_vm0 = vcmp.lt.f32.partialorder %v176_v55, 0.0004427343 }
  0x3b   :  { %147 = vperm.xlu1 %249, %v53_v2   ;;  %255 = vlog2.f32 %v170_v15  ;;  %v203_v27 = vld [vmem:[#allocation2] sm:$0x1] }
  0x3c   :  { %v175_v2 = vmul.f32 %v398_v14, %v174_v51 }
  0x44   :  { %v254_v17 = vpop.eup %253 }
  0x45   :  { %v184_v22 = vmul.f32 %v254_v17, %v398_v14  ;;  %v256_v52 = vpop.eup %255 }
  0x46   :  { %v172_v0 = vmul.f32 0.6931472, %v256_v52 }
  0x47   :  { %v185_v26 = vsel %vm183_vm1, %v254_v17, %v184_v22  ;;  %vm121_vm1 = vcmp.eq.s32.totalorder %v120_v57, 1 }
  0x48   :  { %v187_v31 = vsub.f32 1.0, %v185_v26  ;;  %v178_v9 = vsel %vm177_vm0, %v175_v2, %v172_v0 }
  0x49   :  { %v179_v16 = vadd.f32 %v178_v9, %v169_v8 }
  0x4a   :  { %v188_v36 = vsel %vm186_vm4, %v185_v26, %v187_v31  ;;  %vm157_vm4 = vcmp.eq.s32.totalorder %v156_v1, 1 }
  0x4b   :  { %v189_v43 = vmax.f32 %v188_v36, 1e-07 }
  0x4d   :  { %v190_v54 = vmin.f32 %v189_v43, 1.0 }
  0x4f   :  { %v191_v6 = vsub.f32 1.0, %v190_v54 }
  0x51   :  { %v192_v12 = vmul.f32 %v191_v6, %v191_v6 }
  0xa6   :  { %v88_v29 = vpop.permute.xlu1 %87  ;;  %v64_v30 = vpop.permute.xlu0 %63 }
  0xa7   :  { %v66_v39 = vsel %vm413_vm6, %v64_v30, 0.0 }
  0xab   :  { %v100_v37 = vpop.permute.xlu1 %99  ;;  %v76_v40 = vpop.permute.xlu0 %75 }
  0xac   :  { %v78_v46 = vsel %vm73_vm8, %v76_v40, %v66_v39 }
  0xad   :  { %v90_v56 = vsel %vm423_vm11, %v88_v29, %v78_v46 }
  0xae   :  { %v102_v3 = vsel %vm97_vm14, %v100_v37, %v90_v56 }
  0xb0   :  { %v112_v49 = vpop.permute.xlu1 %111  ;;  %v124_v4 = vpop.permute.xlu0 %123 }
  0xb1   :  { %v114_v7 = vsel %vm437_vm15, %v112_v49, %v102_v3 }
  0xb2   :  { %v126_v10 = vsel %vm121_vm1, %v124_v4, %v114_v7 }
  0xb5   :  { %v136_v5 = vpop.permute.xlu1 %135  ;;  %v160_v11 = vpop.permute.xlu0 %159 }
  0xb6   :  { %v138_v13 = vsel %vm133_vm2, %v136_v5, %v126_v10 }
  0xba   :  { %v148_v14 = vpop.permute.xlu1 %147 }
  0xbb   :  { %v150_v15 = vsel %vm145_vm3, %v148_v14, %v138_v13 }
  0xbc   :  { %v162_v17 = vsel %vm157_vm4, %v160_v11, %v150_v15 }
  0xbd   :  { %v193_v18 = vmul.f32 %v192_v12, %v162_v17 }
  0xbf   :  { %v194_v19 = vmul.f32 %v193_v18, %v179_v16 }
  0xc1   :  { %195 = vadd.xlane.f32.xlu1 %v194_v19 }
 0x14e   :  { %v196_v21 = vpop.xlane.xlu1 %195 }
 0x14f   :  { %v197_v22 = vrot.slane %v196_v21, 4 }
 0x151   :  { %v198_v23 = vadd.f32 %v197_v22, %v196_v21 }
 0x153   :  { %v199_v24 = vrot.slane %v198_v23, 2 }
 0x155   :  { %v200_v25 = vadd.f32 %v199_v24, %v198_v23 }
 0x157   :  { %v201_v26 = vrot.slane %v200_v25, 1 }
 0x159   :  { %v202_v28 = vadd.f32 %v201_v26, %v200_v25 }
 0x15b   :  { %v204_v29 = vadd.f32 %v203_v27, %v202_v28 }
 0x15d   :  { %206 = vst.msk [vmem:[#allocation2] sm:$0x1] %vm46_vm5, %v204_v29 }
 0x164   :  { %v210_v30 = vld [vmem:[#allocation2] sm:$0x1] }
 0x165   :  { %v211_v31 = vmul.f32 0.125, %v210_v30 }
 0x167   :  { %212 = vst.msk [vmem:[#allocation8] sm:$0x1] %vm46_vm5, %v211_v31 }
 0x168   :  { %312 = shalt.err (!%p309_p6)
}
 0x169   :  { %s313_s19 = scalar_lea.hbm %s468_s4, 16 }
 0x16a   :  { %p314_p7 = scmp.ne.s32.totalorder %s468_s4, %s313_s19  ;;  %p317_p8 = scmp.lt.u32.totalorder %s313_s19, %s468_s4 }
 0x16c   :  { %p319_p9 = pnand %p317_p8, %p314_p7 }
 0x16e   :  { %322 = shalt.err (!%p319_p9)
}
 0x16f   :  { %222 = dma.vmem_to_hbm [thread:$0]  %s220_s14, 16, %s468_s4, [#allocation5]  }
 0x170   :  { %327 = dma.done.wait [#allocation5], 16  }
 0x171   :  { %328 = vsyncadd [#allocation5], 4294967280 }
 0x172   :  { %226 = vsyncpa [#allocation4], 1 }
 0x173   :  { %227 = vsyncpa [#allocation7], 1 }
 0x174   :  { %228 = vsyncpa [#allocation5], 1 }

</bundles_post_ra>
